<compile_context>
chip_gen: v7x
topology: tpu7x:2x2x1
jax: 0.10.0
libtpu: 0.0.40
codegen_flags: <defaults>
</compile_context>

<pallas_src>
import functools

import jax
import jax.numpy as jnp
from jax import lax
from jax.experimental import pallas as pl
from jax.experimental.pallas import tpu as pltpu


_SMALL_PATH_BYTES = 4 << 20  # whole problem below this -> single-block kernel


def _round_up(x: int, m: int) -> int:
    return ((x + m - 1) // m) * m


def _choose_tile_and_pad(dim: int, unit: int, cap: int):
    """Pick (tile, padded_dim): tile is a multiple of `unit`, <= cap, and
    divides padded_dim. Prefers divisors of the minimal padded dim (no extra
    padding); falls back to padding up to a multiple of `cap` if the best
    divisor is too small."""
    dp = _round_up(dim, unit)
    if dp <= cap:
        return dp, dp
    best = unit
    t = unit
    while t <= cap:
        if dp % t == 0:
            best = t
        t += unit
    if best >= cap // 2:
        return best, dp
    return cap, _round_up(dim, cap)


# ---------------------------------------------------------------------------
# Kernels
# ---------------------------------------------------------------------------


def _small_linear_kernel(x_ref, w_ref, b_ref, o_ref):
    # Whole problem in one block: (M,K) . (N,K) contracted on K -> (M,N).
    acc = lax.dot_general(
        x_ref[...],
        w_ref[...],
        dimension_numbers=(((1,), (1,)), ((), ())),
        preferred_element_type=jnp.float32,
    )
    o_ref[...] = (acc + b_ref[...].astype(jnp.float32)).astype(o_ref.dtype)


def _linear_kernel_accout(x_ref, w_ref, b_ref, o_ref):
    # f32 output: accumulate directly into the resident output tile.
    @pl.when(pl.program_id(2) == 0)
    def _():
        o_ref[...] = jnp.broadcast_to(
            b_ref[...].astype(o_ref.dtype), o_ref.shape
        )

    o_ref[...] += lax.dot_general(
        x_ref[...],
        w_ref[...],
        dimension_numbers=(((1,), (1,)), ((), ())),
        preferred_element_type=jnp.float32,
    )


def _linear_kernel_scratch(x_ref, w_ref, b_ref, o_ref, acc_ref):
    # Narrow output dtype: f32 scratch accumulator + cast epilogue.
    k = pl.program_id(2)

    @pl.when(k == 0)
    def _():
        acc_ref[...] = jnp.zeros_like(acc_ref)

    acc_ref[...] += lax.dot_general(
        x_ref[...],
        w_ref[...],
        dimension_numbers=(((1,), (1,)), ((), ())),
        preferred_element_type=jnp.float32,
    )

    @pl.when(k == pl.num_programs(2) - 1)
    def _():
        o_ref[...] = (
            acc_ref[...] + b_ref[...].astype(jnp.float32)
        ).astype(o_ref.dtype)


# ---------------------------------------------------------------------------
# Wrapper
# ---------------------------------------------------------------------------


@functools.partial(jax.jit, static_argnames=("tm_cap", "tn_cap", "tk_cap"))
def user_adaptation_forward(x, weight, bias, *, tm_cap=512, tn_cap=512, tk_cap=1024):
    """y = x @ weight.T + bias via Pallas TPU kernels.

    x:      (M, input_size)
    weight: (output_size, input_size)   (PyTorch Linear layout)
    bias:   (output_size,)
    returns (M, output_size)
    """
    M, K = x.shape
    N, Kw = weight.shape
    assert K == Kw, "weight/input size mismatch"
    out_dtype = x.dtype

    x_item = jnp.dtype(x.dtype).itemsize
    w_item = jnp.dtype(weight.dtype).itemsize
    b_item = jnp.dtype(bias.dtype).itemsize
    o_item = jnp.dtype(out_dtype).itemsize

    total_bytes = M * K * x_item + N * K * w_item + N * b_item + M * N * o_item

    # ---------------- small-problem fast path: one block, no grid, no pad ----
    if total_bytes <= _SMALL_PATH_BYTES:
        return pl.pallas_call(
            _small_linear_kernel,
            out_shape=jax.ShapeDtypeStruct((M, N), out_dtype),
        )(x, weight, bias.reshape(1, N))

    # ---------------- tiled path ---------------------------------------------
    tm, Mp = _choose_tile_and_pad(M, 8, tm_cap)
    tn, Np = _choose_tile_and_pad(N, 128, tn_cap)
    tk, Kp = _choose_tile_and_pad(K, 128, tk_cap)

    # v7x megacore: make sure at least one "parallel" axis has >= 2 blocks.
    if (Mp // tm) * (Np // tn) < 2:
        if tn >= 256 and tn % 256 == 0:
            tn //= 2
        elif tm >= 16 and tm % 16 == 0:
            tm //= 2

    # Zero-pad only when needed (exact for matmul + bias; sliced off below).
    x_p = x if (Mp == M and Kp == K) else jnp.pad(x, ((0, Mp - M), (0, Kp - K)))
    w_p = weight if (Np == N and Kp == K) else jnp.pad(
        weight, ((0, Np - N), (0, Kp - K))
    )
    b_p = bias if Np == N else jnp.pad(bias, (0, Np - N))
    b_p = b_p.reshape(1, Np)

    grid = (Mp // tm, Np // tn, Kp // tk)

    accumulate_into_output = out_dtype == jnp.float32
    if accumulate_into_output:
        kernel = _linear_kernel_accout
        scratch_shapes = []
        acc_bytes = 0
    else:
        kernel = _linear_kernel_scratch
        scratch_shapes = [pltpu.VMEM((tm, tn), jnp.float32)]
        acc_bytes = tm * tn * 4

    # Double-buffered working set + accumulator, with headroom; cap for v7x.
    vmem_est = (
        2 * (tm * tk * x_item + tk * tn * w_item + tn * b_item)
        + 2 * tm * tn * o_item
        + acc_bytes
    )
    vmem_limit = int(min(48 << 20, max(2 * vmem_est + (2 << 20), 16 << 20)))

    cost = pl.CostEstimate(
        flops=2 * Mp * Np * Kp,
        transcendentals=0,
        bytes_accessed=(
            Mp * Kp * x_item + Np * Kp * w_item + Np * b_item + Mp * Np * o_item
        ),
    )

    y_p = pl.pallas_call(
        kernel,
        out_shape=jax.ShapeDtypeStruct((Mp, Np), out_dtype),
        grid_spec=pltpu.PrefetchScalarGridSpec(
            num_scalar_prefetch=0,
            grid=grid,
            in_specs=[
                pl.BlockSpec((tm, tk), lambda i, j, k: (i, k)),   # x tile
                pl.BlockSpec((tn, tk), lambda i, j, k: (j, k)),   # W tile (N,K)
                pl.BlockSpec((1, tn), lambda i, j, k: (0, j)),    # bias (resident over i,k)
            ],
            out_specs=pl.BlockSpec((tm, tn), lambda i, j, k: (i, j)),
            scratch_shapes=scratch_shapes,
        ),
        compiler_params=pltpu.CompilerParams(
            dimension_semantics=("parallel", "parallel", "arbitrary"),
            vmem_limit_bytes=vmem_limit,
        ),
        cost_estimate=cost,
    )(x_p, w_p, b_p)

    if Mp == M and Np == N:
        return y_p
    return y_p[:M, :N]


if __name__ == "__main__":
    key = jax.random.PRNGKey(0)
    k_x, k_w, k_b, k_x2, k_w2, k_b2 = jax.random.split(key, 6)

    # --- Module-sized shapes (small fast path) ------------------------------
    batch = 8
    input_size = 32
    output_size = 32  # == input_size -> identity init, zero bias (per __init__)

    x = jax.random.normal(k_x, (batch, input_size), dtype=jnp.float32)

    # Case 1: module's deterministic init (eye_ weight, zeros_ bias) -> y == x.
    weight_eye = jnp.eye(output_size, input_size, dtype=jnp.float32)
    bias_zero = jnp.zeros((output_size,), dtype=jnp.float32)
    y_eye = jax.block_until_ready(user_adaptation_forward(x, weight_eye, bias_zero))
    assert y_eye.shape == (batch, output_size)
    assert jnp.allclose(y_eye, x, atol=1e-5)

    # Case 2: general weights/bias, checked against a pure-JAX reference.
    weight = jax.random.normal(k_w, (output_size, input_size), dtype=jnp.float32) * 0.1
    bias = jax.random.normal(k_b, (output_size,), dtype=jnp.float32) * 0.1
    y = jax.block_until_ready(user_adaptation_forward(x, weight, bias))
    y_ref = x @ weight.T + bias
    assert jnp.allclose(y, y_ref, atol=1e-4, rtol=1e-4)

    # Case 3: larger shapes to exercise the tiled (grid) path.
    M2, K2, N2 = 512, 1024, 768
    x2 = jax.random.normal(k_x2, (M2, K2), dtype=jnp.float32) * 0.05
    w2 = jax.random.normal(k_w2, (N2, K2), dtype=jnp.float32) * 0.05
    b2 = jax.random.normal(k_b2, (N2,), dtype=jnp.float32) * 0.1
    y2 = jax.block_until_ready(user_adaptation_forward(x2, w2, b2))
    y2_ref = x2 @ w2.T + b2
    assert y2.shape == (M2, N2)
    assert jnp.allclose(y2, y2_ref, atol=2e-3, rtol=2e-3)

    print("KERNEL_OK")
</pallas_src>

<mosaic_0001>
module attributes {stable_mosaic.version = 11 : i64} {
  func.func @_small_linear_kernel(%arg0: memref<8x32xf32, #tpu.memory_space<vmem>>, %arg1: memref<32x32xf32, #tpu.memory_space<vmem>>, %arg2: memref<1x32xf32, #tpu.memory_space<vmem>>, %arg3: memref<8x32xf32, #tpu.memory_space<vmem>>) attributes {dimension_semantics = [], scalar_prefetch = 0 : i64, scratch_operands = 0 : i64, tpu.core_type = #tpu.core_type<tc>} {
    %c0 = arith.constant 0 : index
    %c0_0 = arith.constant 0 : index
    %0 = vector.load %arg0[%c0, %c0_0] : memref<8x32xf32, #tpu.memory_space<vmem>>, vector<8x32xf32>
    %c0_1 = arith.constant 0 : index
    %c0_2 = arith.constant 0 : index
    %1 = vector.load %arg1[%c0_1, %c0_2] : memref<32x32xf32, #tpu.memory_space<vmem>>, vector<32x32xf32>
    %cst = arith.constant dense<0.000000e+00> : vector<8x32xf32>
    %2 = tpu.matmul %0, %1, %cst {dimension_numbers = #tpu.dot_dimension_numbers<[1], [1], [0], [0], [0, 0, 1, 0], [], []>} : vector<8x32xf32>, vector<32x32xf32>, vector<8x32xf32> -> vector<8x32xf32>
    %c0_3 = arith.constant 0 : index
    %c0_4 = arith.constant 0 : index
    %3 = vector.load %arg2[%c0_3, %c0_4] : memref<1x32xf32, #tpu.memory_space<vmem>>, vector<1x32xf32>
    %4 = vector.broadcast %3 : vector<1x32xf32> to vector<8x32xf32>
    %5 = arith.addf %2, %4 : vector<8x32xf32>
    %c0_5 = arith.constant 0 : index
    %c0_6 = arith.constant 0 : index
    %6 = vector.load %arg3[%c0_5, %c0_6] : memref<8x32xf32, #tpu.memory_space<vmem>>, vector<8x32xf32>
    tpu.vector_store %arg3[%c0_5, %c0_6], %5 {strides = array<i32>} : memref<8x32xf32, #tpu.memory_space<vmem>>, vector<8x32xf32>,
    return
  }
}

</mosaic_0001>

<bundles_post_ra>
// kernel: user_adaptation_forward.1
= control target key start
LH: loop header
LB: loop body
LE: loop exit
PB: predicated region body
PF: predicated region fallthrough
CT: control target
= control target key end

     0   :  { %8 = vsyncpa [#allocation3], 0  ;;  %s344_s0 = inlined_call_operand.hbm [shape: f32[8,32], index: 0, kind: input, shape index: {}]   ;;  %s345_s1 = inlined_call_operand.hbm [shape: f32[32,32], index: 1, kind: input, shape index: {}]   ;;  %s346_s2 = inlined_call_operand.vmem [shape: f32[1,32], index: 2, kind: input, shape index: {}]   ;;  %s347_s3 = inlined_call_operand.hbm [shape: f32[8,32], index: 3, kind: output, shape index: {}]  }
   0x1   :  { %9 = vsyncpa [#allocation6], 0 }
   0x2   :  { %10 = vsyncpa [#allocation4], 0  ;;  %s266_s12 = smov [#allocation2]   ;;  %s267_s14 = smov [#allocation5]  }
   0x3   :  { %s17_s13 = sshll.u32 %s266_s12, 4  ;;  %s26_s15 = sshll.u32 %s267_s14, 4  ;;  %s18_s13 = int_to_ptr.vmem [resolvable:$true] %s17_s13  ;;  %s294_s15 = int_to_ptr.vmem [resolvable:$true] %s26_s15 }
   0x4   :  { %s194_s18 = scalar_lea.hbm %s344_s0, 128 }
   0x5   :  { %p195_p0 = scmp.ne.s32.totalorder %s344_s0, %s194_s18  ;;  %p198_p1 = scmp.lt.u32.totalorder %s194_s18, %s344_s0 }
   0x7   :  { %p200_p2 = pnand %p198_p1, %p195_p0 }
   0x9   :  { %203 = shalt.err (!%p200_p2)
}
   0xa   :  { %s204_s23 = scalar_lea.vmem %s18_s13, 128  ;;  %p209_p4 = scmp.lt.s32.totalorder %s18_s13, %s18_s13 }
   0xb   :  { %p205_p3 = scmp.ne.s32.totalorder %s18_s13, %s204_s23  ;;  %p210_p5 = scmp.lt.s32.totalorder %s204_s23, %s204_s23 }
   0xd   :  { %p211_p6 = por %p210_p5, %p209_p4 }
   0xf   :  { %p212_p7 = pnand %p211_p6, %p205_p3 }
  0x11   :  { %215 = shalt.err (!%p212_p7)
}
  0x12   :  { %20 = dma.hbm_to_vmem [thread:$0]  %s344_s0, 128, %s18_s13, [#allocation3]  }
  0x13   :  { %s216_s28 = scalar_lea.hbm %s345_s1, 512 }
  0x14   :  { %p217_p8 = scmp.ne.s32.totalorder %s345_s1, %s216_s28  ;;  %p220_p9 = scmp.lt.u32.totalorder %s216_s28, %s345_s1 }
  0x16   :  { %p222_p10 = pnand %p220_p9, %p217_p8 }
  0x18   :  { %225 = shalt.err (!%p222_p10)
}
  0x19   :  { %s226_s6 = scalar_lea.vmem %s294_s15, 512  ;;  %p231_p12 = scmp.lt.s32.totalorder %s294_s15, %s294_s15 }
  0x1a   :  { %p227_p11 = scmp.ne.s32.totalorder %s294_s15, %s226_s6  ;;  %p232_p13 = scmp.lt.s32.totalorder %s226_s6, %s226_s6 }
  0x1c   :  { %p233_p0 = por %p232_p13, %p231_p12 }
  0x1e   :  { %p234_p1 = pnand %p233_p0, %p227_p11 }
  0x20   :  { %237 = shalt.err (!%p234_p1)
}
  0x21   :  { %s268_s0 = smov 128   ;;  %s269_s7 = smov 8  }
  0x22   :  { %32 = dma.hbm_to_vmem [thread:$0]  %s345_s1, 512, %s294_s15, [#allocation6], %s268_s0, %s268_s0, %s269_s7  }
  0x23   :  { %260 = dma.done.wait [#allocation3], 128  }
  0x24   :  { %261 = vsyncadd [#allocation3], 4294967168 }
  0x25   :  { %262 = dma.done.wait [#allocation6], 512  }
  0x26   :  { %263 = vsyncadd [#allocation6], 4294966784  ;;  %v270_v0 = vmov 0.0|0.0   ;;  %vm271_vm0 = vmmov 0   ;;  %v272_v1 = vmov 0.0   ;;  %vm53_vm1 = vcmask 261120  }
  0x27   :  { %178 = vmatprep.subr.bf16.mxu0 %v270_v0  ;;  %175 = vmatprep.mubr.msk.f32.mxu0 %vm271_vm0, %v272_v1  ;;  %v42_v2 = vld [vmem:[#allocation5] sm:$0xff]  ;;  %v43_v3 = vld [vmem:[#allocation5 + $0x8] sm:$0xff]  ;;  %vm180_vm2 = vmpackc.low %vm53_vm1, %vm53_vm1  ;;  %s273_s11 = smov [#allocation7]  }
  0x28   :  { %v179_v4 = vpack.c.bf16 %v43_v3, %v42_v2  ;;  %v44_v5 = vld [vmem:[#allocation5 + $0x10] sm:$0xff]  ;;  %v45_v6 = vld [vmem:[#allocation5 + $0x18] sm:$0xff]  ;;  %s146_s12 = sshll.u32 %s273_s11, 4  ;;  %s147_s12 = int_to_ptr.vmem [resolvable:$true] %s146_s12 }
  0x29   :  { %v183_v7 = vpack.c.bf16 %v45_v6, %v44_v5  ;;  %v41_v8 = vld [vmem:[#allocation2] sm:$0xff]  ;;  %s238_s13 = scalar_lea.vmem %s147_s12, 128  ;;  %p243_p3 = scmp.lt.s32.totalorder %s147_s12, %s147_s12 }
  0x2a   :  { %181 = vmatpush3.bf16.xpose.msk.msra.mxu0 %vm180_vm2, %v179_v4  ;;  %v156_v9 = vld [vmem:[%s346_s2] ss:$0 sm:$0xff]  ;;  %p239_p2 = scmp.ne.s32.totalorder %s147_s12, %s238_s13  ;;  %p244_p4 = scmp.lt.s32.totalorder %s238_s13, %s238_s13 }
  0x2b   :  { %182 = vmatprep.subr.bf16.mxu0 %v270_v0 }
  0x2c   :  { %p245_p5 = por %p244_p4, %p243_p3 }
  0x2e   :  { %p246_p6 = pnand %p245_p5, %p239_p2 }
  0x32   :  { %185 = vmatpush3.bf16.xpose.msk.msra.mxu0 %vm180_vm2, %v183_v7 }
  0x39   :  { %176 = vmatmul.mubr.msk.f32.vlgmr.msra.gmra.mrb[0].mxu0 %vm53_vm1, %v41_v8 }
 0x10c   :  { %v135_v10 = vpop.f32.mrb[0].mxu0 }
 0x10d   :  { %v136_v11 = vadd.f32 %v156_v9, %v135_v10  ;;  %v177_v12 = vpop.f32.mrb[1].mxu0 }
 0x10f   :  { %139 = vst.msk [vmem:[#allocation7] sm:$0xff] %vm53_vm1, %v136_v11 }
 0x110   :  { %249 = shalt.err (!%p246_p6)
}
 0x111   :  { %s250_s16 = scalar_lea.hbm %s347_s3, 128 }
 0x112   :  { %p251_p7 = scmp.ne.s32.totalorder %s347_s3, %s250_s16  ;;  %p254_p8 = scmp.lt.u32.totalorder %s250_s16, %s347_s3 }
 0x114   :  { %p256_p9 = pnand %p254_p8, %p251_p7 }
 0x116   :  { %259 = shalt.err (!%p256_p9)
}
 0x117   :  { %149 = dma.vmem_to_hbm [thread:$0]  %s147_s12, 128, %s347_s3, [#allocation4]  }
 0x118   :  { %264 = dma.done.wait [#allocation4], 128  }
 0x119   :  { %265 = vsyncadd [#allocation4], 4294967168 }
 0x11a   :  { %153 = vsyncpa [#allocation3], 1 }
 0x11b   :  { %154 = vsyncpa [#allocation6], 1 }
 0x11c   :  { %155 = vsyncpa [#allocation4], 1 }

</bundles_post_ra>
